<compile_context>
chip_gen: v7x
topology: tpu7x:2x2x1
jax: 0.10.0
libtpu: 0.0.40
codegen_flags: <defaults>
</compile_context>

<pallas_src>
import functools

import jax
import jax.numpy as jnp
import numpy as np
from jax import lax
from jax.experimental import pallas as pl
from jax.experimental.pallas import tpu as pltpu


def _round_up(n: int, m: int) -> int:
    return ((n + m - 1) // m) * m


def _vmem_capacity_bytes() -> int:
    # Generation-aware VMEM cap; conservative fallback = v7x per-core 64 MiB.
    try:
        return int(pltpu.get_tpu_info().vmem_capacity_bytes)
    except Exception:
        return 64 << 20


def mlp_kernel(x_ref, w1_ref, b1_ref, w2_ref, b2_ref, o_ref, *,
               approximate, precision):
    # x_ref: (tm, obs)   w1_ref: (obs, hid)   b1_ref: (1, hid)
    # w2_ref: (hid, obs) b2_ref: (1, obs)     o_ref: (tm, obs)
    h = jnp.dot(x_ref[...], w1_ref[...],
                preferred_element_type=jnp.float32, precision=precision)
    h = h + b1_ref[...].astype(jnp.float32)

    if approximate:
        # tanh-approx GELU: tanh runs on the EUP (separate VLIW slot).
        c = jnp.float32(0.7978845608028654)          # sqrt(2/pi)
        h = 0.5 * h * (1.0 + jnp.tanh(c * (h + 0.044715 * h * h * h)))
    else:
        # exact GELU (PyTorch nn.GELU default): 0.5*h*(1+erf(h/sqrt(2)))
        h = 0.5 * h * (1.0 + lax.erf(h * jnp.float32(0.7071067811865476)))

    y = jnp.dot(h.astype(w2_ref.dtype), w2_ref[...],
                preferred_element_type=jnp.float32, precision=precision)
    y = y + b2_ref[...].astype(jnp.float32)
    o_ref[...] = y.astype(o_ref.dtype)


@functools.partial(
    jax.jit,
    static_argnames=("tm", "approximate", "precision", "operand_dtype"))
def mlp_forward(x, w1_pt, b1_pt, w2_pt, b2_pt, *, tm=None, approximate=False,
                precision=lax.Precision.HIGHEST, operand_dtype=None):
    """Fused MLP forward (matches torch MLP.forward).

    x:     (B, obs)           float32
    w1_pt: (hidden, obs)      PyTorch nn.Linear weight convention
    b1_pt: (hidden,)
    w2_pt: (obs, hidden)
    b2_pt: (obs,)
    Returns (B, obs) float32.
    """
    B, obs = x.shape
    hidden = w1_pt.shape[0]
    out_dtype = x.dtype

    op_dtype = jnp.dtype(operand_dtype) if operand_dtype is not None else jnp.dtype(x.dtype)
    if op_dtype != jnp.float32:
        precision = None  # precision passes only apply to the f32 MXU path

    # Row tile: multiple of 8 sublanes; up to 1024 rows (~85% HBM roofline),
    # and >= 2 grid steps once B is large enough so a v7x chip can use both
    # TensorCores on the "parallel" axis.
    if tm is None:
        tm = min(_round_up(B, 8), 1024)
        if B >= 512:
            tm = min(tm, _round_up(pl.cdiv(B, 2), 8))
    tm = max(8, (int(tm) // 8) * 8)
    grid = pl.cdiv(B, tm)
    B_p = grid * tm

    # Kernel-layout operands (weights as (in, out)); NO feature padding --
    # blocks use the natural last dim (== full array dim), avoiding the 8x
    # HBM inflation of padding obs/hidden to 128.  Rows are zero-padded only
    # when B is not a multiple of tm (cheap, fused under jit, sliced off at
    # the end; padded rows never mix with real rows).
    xp = x.astype(op_dtype)
    if B_p != B:
        xp = jnp.pad(xp, ((0, B_p - B), (0, 0)))
    w1 = w1_pt.T.astype(op_dtype)                   # (obs, hidden)
    w2 = w2_pt.T.astype(op_dtype)                   # (hidden, obs)
    b1 = b1_pt.reshape(1, hidden).astype(jnp.float32)
    b2 = b2_pt.reshape(1, obs).astype(jnp.float32)

    # VMEM budget: double-buffered x/out tiles, resident weights/biases, the
    # f32 (tm, hidden) intermediate + GELU temporaries, clamped against the
    # chip's per-core VMEM (64 MiB on v7x, 128 MiB on v5e/v6e).
    op_sz = op_dtype.itemsize
    need = (2 * tm * obs * op_sz                    # x tile, double buffered
            + 2 * tm * obs * 4                      # out tile, double buffered
            + 2 * 2 * obs * hidden * op_sz          # w1 + w2 (default buffering)
            + 2 * (hidden + obs) * 4                # biases
            + 4 * tm * hidden * 4)                  # h + elementwise temporaries
    max_limit = int(0.75 * _vmem_capacity_bytes())
    vmem_limit = int(min(max(2 * need, 32 << 20), max_limit))

    cost = pl.CostEstimate(
        flops=4 * B_p * obs * hidden,               # two matmuls
        transcendentals=B_p * hidden,               # one erf/tanh per hidden elem
        bytes_accessed=(B_p * obs * (op_sz + 4)
                        + 2 * obs * hidden * op_sz
                        + (hidden + obs) * 4))

    kernel = functools.partial(mlp_kernel, approximate=approximate,
                               precision=precision)

    out = pl.pallas_call(
        kernel,
        out_shape=jax.ShapeDtypeStruct((B_p, obs), out_dtype),
        grid_spec=pltpu.PrefetchScalarGridSpec(
            num_scalar_prefetch=0,
            grid=(grid,),
            in_specs=[
                pl.BlockSpec((tm, obs), lambda i: (i, 0)),
                pl.BlockSpec((obs, hidden), lambda i: (0, 0)),   # resident
                pl.BlockSpec((1, hidden), lambda i: (0, 0)),     # resident
                pl.BlockSpec((hidden, obs), lambda i: (0, 0)),   # resident
                pl.BlockSpec((1, obs), lambda i: (0, 0)),        # resident
            ],
            out_specs=pl.BlockSpec((tm, obs), lambda i: (i, 0)),
        ),
        compiler_params=pltpu.CompilerParams(
            dimension_semantics=("parallel",),
            vmem_limit_bytes=vmem_limit),
        cost_estimate=cost,
    )(xp, w1, b1, w2, b2)

    return out[:B] if B_p != B else out


def mlp_reference(x, w1_pt, b1_pt, w2_pt, b2_pt, *, approximate=False):
    h = jnp.dot(x, w1_pt.T, precision=lax.Precision.HIGHEST) + b1_pt
    if approximate:
        c = jnp.float32(0.7978845608028654)
        h = 0.5 * h * (1.0 + jnp.tanh(c * (h + 0.044715 * h * h * h)))
    else:
        h = 0.5 * h * (1.0 + lax.erf(h * jnp.float32(0.7071067811865476)))
    return jnp.dot(h, w2_pt.T, precision=lax.Precision.HIGHEST) + b2_pt


if __name__ == "__main__":
    obs_dim, hidden_dim = 16, 32

    key = jax.random.PRNGKey(0)
    kx, kw1, kb1, kw2, kb2, kx2 = jax.random.split(key, 6)

    # PyTorch nn.Linear parameter convention: weight (out, in), bias (out,).
    w1_pt = jax.random.normal(kw1, (hidden_dim, obs_dim), jnp.float32) * 0.1
    b1_pt = jax.random.normal(kb1, (hidden_dim,), jnp.float32) * 0.1
    w2_pt = jax.random.normal(kw2, (obs_dim, hidden_dim), jnp.float32) * 0.1
    b2_pt = jax.random.normal(kb2, (obs_dim,), jnp.float32) * 0.1

    # --- test 1: small batch, exact (erf) GELU, default tiling -------------
    x = jax.random.normal(kx, (8, obs_dim), jnp.float32)
    out = jax.block_until_ready(mlp_forward(x, w1_pt, b1_pt, w2_pt, b2_pt))
    ref = mlp_reference(x, w1_pt, b1_pt, w2_pt, b2_pt)
    np.testing.assert_allclose(np.asarray(out), np.asarray(ref),
                               rtol=1e-5, atol=1e-5)

    # --- test 2: B not a multiple of tm -> multi-step grid + row-pad tail --
    x2 = jax.random.normal(kx2, (200, obs_dim), jnp.float32)
    out2 = jax.block_until_ready(
        mlp_forward(x2, w1_pt, b1_pt, w2_pt, b2_pt, tm=64))
    ref2 = mlp_reference(x2, w1_pt, b1_pt, w2_pt, b2_pt)
    np.testing.assert_allclose(np.asarray(out2), np.asarray(ref2),
                               rtol=1e-5, atol=1e-5)

    # --- test 3: tanh-approx GELU path (EUP offload) ------------------------
    out3 = jax.block_until_ready(
        mlp_forward(x, w1_pt, b1_pt, w2_pt, b2_pt, approximate=True))
    ref3 = mlp_reference(x, w1_pt, b1_pt, w2_pt, b2_pt, approximate=True)
    np.testing.assert_allclose(np.asarray(out3), np.asarray(ref3),
                               rtol=1e-5, atol=1e-5)

    # --- test 4: bf16-operand path (v6e/v7x), f32 accumulation --------------
    out4 = jax.block_until_ready(
        mlp_forward(x, w1_pt, b1_pt, w2_pt, b2_pt, operand_dtype=jnp.bfloat16))
    np.testing.assert_allclose(np.asarray(out4), np.asarray(ref),
                               rtol=2e-2, atol=2e-2)

    print("KERNEL_OK")
</pallas_src>

<mosaic_0001>
module attributes {stable_mosaic.version = 11 : i64} {
  func.func @mlp_kernel(%arg0: i32, %arg1: memref<8x16xf32, #tpu.memory_space<vmem>>, %arg2: memref<16x32xf32, #tpu.memory_space<vmem>>, %arg3: memref<1x32xf32, #tpu.memory_space<vmem>>, %arg4: memref<32x16xf32, #tpu.memory_space<vmem>>, %arg5: memref<1x16xf32, #tpu.memory_space<vmem>>, %arg6: memref<8x16xf32, #tpu.memory_space<vmem>>) attributes {dimension_semantics = [#tpu.dimension_semantics<parallel>], iteration_bounds = array<i64: 1>, scalar_prefetch = 0 : i64, scratch_operands = 0 : i64, tpu.core_type = #tpu.core_type<tc>, window_params = [{transform_indices = @transform_0, window_bounds = array<i64: 8, 16>}, {pipeline_mode = #tpu.pipeline_mode<synchronous>, transform_indices = @transform_1, window_bounds = array<i64: 16, 32>}, {pipeline_mode = #tpu.pipeline_mode<synchronous>, transform_indices = @transform_2, window_bounds = array<i64: 1, 32>}, {pipeline_mode = #tpu.pipeline_mode<synchronous>, transform_indices = @transform_3, window_bounds = array<i64: 32, 16>}, {pipeline_mode = #tpu.pipeline_mode<synchronous>, transform_indices = @transform_4, window_bounds = array<i64: 1, 16>}, {transform_indices = @transform_5, window_bounds = array<i64: 8, 16>}]} {
    %c0 = arith.constant 0 : index
    %c0_0 = arith.constant 0 : index
    %0 = vector.load %arg1[%c0, %c0_0] : memref<8x16xf32, #tpu.memory_space<vmem>>, vector<8x16xf32>
    %c0_1 = arith.constant 0 : index
    %c0_2 = arith.constant 0 : index
    %1 = vector.load %arg2[%c0_1, %c0_2] : memref<16x32xf32, #tpu.memory_space<vmem>>, vector<16x32xf32>
    %cst = arith.constant dense<0.000000e+00> : vector<8x32xf32>
    %2 = tpu.matmul %0, %1, %cst {dimension_numbers = #tpu.dot_dimension_numbers<[1], [0], [0], [1], [0, 0, 1, 1], [], []>, precision = #tpu.contract_precision<fp32>} : vector<8x16xf32>, vector<16x32xf32>, vector<8x32xf32> -> vector<8x32xf32>
    %c0_3 = arith.constant 0 : index
    %c0_4 = arith.constant 0 : index
    %3 = vector.load %arg3[%c0_3, %c0_4] : memref<1x32xf32, #tpu.memory_space<vmem>>, vector<1x32xf32>
    %4 = vector.broadcast %3 : vector<1x32xf32> to vector<8x32xf32>
    %5 = arith.addf %2, %4 : vector<8x32xf32>
    %cst_5 = arith.constant 5.000000e-01 : f32
    %6 = vector.broadcast %cst_5 : f32 to vector<8x32xf32>
    %7 = arith.mulf %6, %5 : vector<8x32xf32>
    %cst_6 = arith.constant 0.707106769 : f32
    %8 = vector.broadcast %cst_6 : f32 to vector<8x32xf32>
    %9 = arith.mulf %5, %8 : vector<8x32xf32>
    %10 = math.erf %9 : vector<8x32xf32>
    %cst_7 = arith.constant 1.000000e+00 : f32
    %11 = vector.broadcast %cst_7 : f32 to vector<8x32xf32>
    %12 = arith.addf %11, %10 : vector<8x32xf32>
    %13 = arith.mulf %7, %12 : vector<8x32xf32>
    %c0_8 = arith.constant 0 : index
    %c0_9 = arith.constant 0 : index
    %14 = vector.load %arg4[%c0_8, %c0_9] : memref<32x16xf32, #tpu.memory_space<vmem>>, vector<32x16xf32>
    %cst_10 = arith.constant dense<0.000000e+00> : vector<8x16xf32>
    %15 = tpu.matmul %13, %14, %cst_10 {dimension_numbers = #tpu.dot_dimension_numbers<[1], [0], [0], [1], [0, 0, 1, 1], [], []>, precision = #tpu.contract_precision<fp32>} : vector<8x32xf32>, vector<32x16xf32>, vector<8x16xf32> -> vector<8x16xf32>
    %c0_11 = arith.constant 0 : index
    %c0_12 = arith.constant 0 : index
    %16 = vector.load %arg5[%c0_11, %c0_12] : memref<1x16xf32, #tpu.memory_space<vmem>>, vector<1x16xf32>
    %17 = vector.broadcast %16 : vector<1x16xf32> to vector<8x16xf32>
    %18 = arith.addf %15, %17 : vector<8x16xf32>
    %c0_13 = arith.constant 0 : index
    %c0_14 = arith.constant 0 : index
    %19 = vector.load %arg6[%c0_13, %c0_14] : memref<8x16xf32, #tpu.memory_space<vmem>>, vector<8x16xf32>
    tpu.vector_store %arg6[%c0_13, %c0_14], %18 {strides = array<i32>} : memref<8x16xf32, #tpu.memory_space<vmem>>, vector<8x16xf32>,
    return
  }
  func.func @transform_0(%arg0: i32) -> (i32, i32) {
    %c0_i32 = arith.constant 0 : i32
    %c0_i32_0 = arith.constant 0 : i32
    return %arg0, %c0_i32 : i32, i32
  }
  func.func @transform_1(%arg0: i32) -> (i32, i32) {
    %c0_i32 = arith.constant 0 : i32
    %c0_i32_0 = arith.constant 0 : i32
    %c0_i32_1 = arith.constant 0 : i32
    return %c0_i32, %c0_i32_0 : i32, i32
  }
  func.func @transform_2(%arg0: i32) -> (i32, i32) {
    %c0_i32 = arith.constant 0 : i32
    %c0_i32_0 = arith.constant 0 : i32
    %c0_i32_1 = arith.constant 0 : i32
    return %c0_i32, %c0_i32_0 : i32, i32
  }
  func.func @transform_3(%arg0: i32) -> (i32, i32) {
    %c0_i32 = arith.constant 0 : i32
    %c0_i32_0 = arith.constant 0 : i32
    %c0_i32_1 = arith.constant 0 : i32
    return %c0_i32, %c0_i32_0 : i32, i32
  }
  func.func @transform_4(%arg0: i32) -> (i32, i32) {
    %c0_i32 = arith.constant 0 : i32
    %c0_i32_0 = arith.constant 0 : i32
    %c0_i32_1 = arith.constant 0 : i32
    return %c0_i32, %c0_i32_0 : i32, i32
  }
  func.func @transform_5(%arg0: i32) -> (i32, i32) {
    %c0_i32 = arith.constant 0 : i32
    %c0_i32_0 = arith.constant 0 : i32
    return %arg0, %c0_i32 : i32, i32
  }
}

</mosaic_0001>

<bundles_post_ra>
// kernel: mlp_forward.1
= control target key start
LH: loop header
LB: loop body
LE: loop exit
PB: predicated region body
PF: predicated region fallthrough
CT: control target
= control target key end

     0   :  { %v1277_v3 = vmov 0.0|0.0   ;;  %vm1278_vm0 = vmmov 0   ;;  %v1279_v6 = vmov 0.0   ;;  %vm31_vm1 = vcmask 130048   ;;  %s1394_s0 = inlined_call_operand.vmem [shape: f32[8,16], index: 0, kind: input, shape index: {}]   ;;  %s1395_s1 = inlined_call_operand.vmem [shape: f32[16,32], index: 1, kind: input, shape index: {}]   ;;  %s1396_s2 = inlined_call_operand.vmem [shape: f32[1,32], index: 2, kind: input, shape index: {}]   ;;  %s1397_s3 = inlined_call_operand.vmem [shape: f32[32,16], index: 3, kind: input, shape index: {}]   ;;  %s1398_s4 = inlined_call_operand.vmem [shape: f32[1,16], index: 4, kind: input, shape index: {}]   ;;  %s1399_s5 = inlined_call_operand.hbm [shape: f32[8,16], index: 5, kind: output, shape index: {}]  }
   0x1   :  { %v22_v0 = vld [vmem:[%s1395_s1] sm:$0xff]  ;;  %v23_v1 = vld [vmem:[%s1395_s1 + $0x8] sm:$0xff]  ;;  %1172 = vmatprep.subr.bf16.mxu0 %v1277_v3  ;;  %1068 = vmatprep.mubr.msk.f32.mxu0 %vm1278_vm0, %v1279_v6 }
   0x2   :  { %v21_v2 = vld [vmem:[%s1394_s0] sm:$0xff]  ;;  %v36_v4 = vand.u32 4294901760, %v22_v0  ;;  %v39_v5 = vand.u32 4294901760, %v23_v1  ;;  %1196 = vmatprep.subr.bf16.mxu1 %v1277_v3  ;;  %1125 = vmatprep.mubr.msk.f32.mxu1 %vm1278_vm0, %v1279_v6 }
   0x3   :  { %v33_v7 = vsel %vm31_vm1, %v21_v2, 0 }
   0x4   :  { %10 = vsyncpa [#allocation3], 0  ;;  %v1173_v8 = vpack.c.bf16 %v39_v5, %v36_v4  ;;  %v114_v9 = vsub.f32 %v22_v0, %v36_v4  ;;  %v121_v10 = vsub.f32 %v23_v1, %v39_v5  ;;  %v102_v11 = vand.u32 4294901760, %v33_v7  ;;  %v499_v25 = vld [vmem:[%s1397_s3] sm:$0xff]  ;;  %v500_v26 = vld [vmem:[%s1397_s3 + $0x8] sm:$0xff]  ;;  %s1280_s7 = smov [#allocation2]  }
   0x5   :  { %v515_v27 = vand.u32 4294901760, %v499_v25  ;;  %v518_v28 = vand.u32 4294901760, %v500_v26  ;;  %v501_v31 = vld [vmem:[%s1397_s3 + $0x10] sm:$0xff]  ;;  %v502_v32 = vld [vmem:[%s1397_s3 + $0x18] sm:$0xff]  ;;  %v1014_v57 = vld [vmem:[%s1396_s2] ss:$0 sm:$0xff] }
   0x6   :  { %1174 = vmatpush3.bf16.msra.mxu0 %v1173_v8  ;;  %v103_v12 = vsub.f32 %v33_v7, %v102_v11  ;;  %v115_v13 = vand.u32 4294901760, %v114_v9  ;;  %v122_v14 = vand.u32 4294901760, %v121_v10  ;;  %v1179_v23 = vpack.c.bf16 %v121_v10, %v114_v9  ;;  %s1006_s8 = sshll.u32 %s1280_s7, 4  ;;  %s1007_s8 = int_to_ptr.vmem [resolvable:$true] %s1006_s8 }
   0x7   :  { %1175 = vmatprep.subr.bf16.mxu0 %v1277_v3  ;;  %v595_v29 = vsub.f32 %v499_v25, %v515_v27  ;;  %v602_v30 = vsub.f32 %v500_v26, %v518_v28  ;;  %v521_v35 = vand.u32 4294901760, %v501_v31  ;;  %v524_v36 = vand.u32 4294901760, %v502_v32  ;;  %s1253_s9 = scalar_lea.vmem %s1007_s8, 128  ;;  %p1258_p1 = scmp.lt.s32.totalorder %s1007_s8, %s1007_s8 }
   0x8   :  { %v104_v15 = vand.u32 4294901760, %v103_v12  ;;  %v116_v16 = vsub.f32 %v114_v9, %v115_v13  ;;  %v123_v17 = vsub.f32 %v121_v10, %v122_v14  ;;  %v1185_v24 = vpack.c.bf16 %v122_v14, %v115_v13  ;;  %p1254_p0 = scmp.ne.s32.totalorder %s1007_s8, %s1253_s9  ;;  %p1259_p2 = scmp.lt.s32.totalorder %s1253_s9, %s1253_s9 }
   0x9   :  { %v596_v33 = vand.u32 4294901760, %v595_v29  ;;  %v603_v34 = vand.u32 4294901760, %v602_v30  ;;  %v609_v39 = vsub.f32 %v501_v31, %v521_v35  ;;  %v616_v40 = vsub.f32 %v502_v32, %v524_v36 }
   0xa   :  { %v105_v18 = vsub.f32 %v103_v12, %v104_v15  ;;  %v117_v19 = vand.u32 4294901760, %v116_v16  ;;  %v124_v20 = vand.u32 4294901760, %v123_v17  ;;  %v1191_v51 = vpack.c.bf16 %v518_v28, %v515_v27  ;;  %p1260_p3 = por %p1259_p2, %p1258_p1 }
   0xb   :  { %v597_v37 = vsub.f32 %v595_v29, %v596_v33  ;;  %v604_v38 = vsub.f32 %v602_v30, %v603_v34  ;;  %v610_v43 = vand.u32 4294901760, %v609_v39  ;;  %v617_v44 = vand.u32 4294901760, %v616_v40 }
   0xc   :  { %v106_v21 = vand.u32 4294901760, %v105_v18  ;;  %v1176_v22 = vpack.c.bf16 %v124_v20, %v117_v19  ;;  %v1203_v52 = vpack.c.bf16 %v602_v30, %v595_v29  ;;  %v1194_v53 = vpack.c.bf16 %v524_v36, %v521_v35  ;;  %p1261_p4 = pnand %p1260_p3, %p1254_p0 }
   0xd   :  { %v598_v41 = vand.u32 4294901760, %v597_v37  ;;  %v605_v42 = vand.u32 4294901760, %v604_v38  ;;  %v611_v46 = vsub.f32 %v609_v39, %v610_v43  ;;  %v618_v47 = vsub.f32 %v616_v40, %v617_v44 }
   0xe   :  { %1069 = vmatmul.mubr.f32.vlgmr.msra.gmra.mrb[0].mxu0 %v106_v21  ;;  %v1206_v54 = vpack.c.bf16 %v616_v40, %v609_v39  ;;  %v1215_v55 = vpack.c.bf16 %v603_v34, %v596_v33  ;;  %v1218_v56 = vpack.c.bf16 %v617_v44, %v610_v43  ;;  %vm510_vm2 = vcmask 261120  }
   0xf   :  { %1177 = vmatpush3.bf16.msra.mxu0 %v1176_v22  ;;  %1075 = vmatprep.mubr.msk.f32.mxu0 %vm1278_vm0, %v1279_v6  ;;  %v1197_v45 = vpack.c.bf16 %v605_v42, %v598_v41  ;;  %v612_v48 = vand.u32 4294901760, %v611_v46  ;;  %v619_v49 = vand.u32 4294901760, %v618_v47 }
  0x10   :  { %1178 = vmatprep.subr.bf16.mxu0 %v1277_v3 }
  0x11   :  { %1198 = vmatpush3.bf16.msra.mxu1 %v1197_v45  ;;  %v1200_v50 = vpack.c.bf16 %v619_v49, %v612_v48 }
  0x12   :  { %1199 = vmatprep.subr.bf16.mxu1 %v1277_v3 }
  0x15   :  { %1201 = vmatpush3.bf16.msra.mxu1 %v1200_v50 }
  0x16   :  { %1076 = vmatmul.mubr.f32.vlgmr.msra.gmra.mrb[0].mxu0 %v102_v11  ;;  %1202 = vmatprep.subr.bf16.mxu1 %v1277_v3 }
  0x17   :  { %1180 = vmatpush3.bf16.msra.mxu0 %v1179_v23  ;;  %1082 = vmatprep.mubr.msk.f32.mxu0 %vm1278_vm0, %v1279_v6 }
  0x18   :  { %1181 = vmatprep.subr.bf16.mxu0 %v1277_v3 }
  0x1e   :  { %1083 = vmatmul.mubr.f32.vlgmr.msra.gmra.mrb[0].mxu0 %v103_v12  ;;  %v1015_v12 = vld [vmem:[%s1398_s4] ss:$0 sm:$0xff] }
  0x1f   :  { %1183 = vmatpush3.bf16.msra.mxu0 %v1173_v8  ;;  %1089 = vmatprep.mubr.msk.f32.mxu0 %vm1278_vm0, %v1279_v6 }
  0x20   :  { %1184 = vmatprep.subr.bf16.mxu0 %v1277_v3 }
  0x26   :  { %1090 = vmatmul.mubr.f32.vlgmr.msra.gmra.mrb[0].mxu0 %v104_v15 }
  0x27   :  { %1186 = vmatpush3.bf16.msra.mxu0 %v1185_v24  ;;  %1096 = vmatprep.mubr.msk.f32.mxu0 %vm1278_vm0, %v1279_v6 }
  0x28   :  { %1187 = vmatprep.subr.bf16.mxu0 %v1277_v3 }
  0x2e   :  { %1097 = vmatmul.mubr.f32.vlgmr.msra.gmra.mrb[0].mxu0 %v102_v11 }
  0x2f   :  { %1189 = vmatpush3.bf16.msra.mxu0 %v1173_v8  ;;  %1103 = vmatprep.mubr.msk.f32.mxu0 %vm1278_vm0, %v1279_v6 }
  0x30   :  { %1190 = vmatprep.subr.bf16.mxu0 %v1277_v3 }
  0x36   :  { %1104 = vmatmul.mubr.f32.vlgmr.msra.gmra.mrb[0].mxu0 %v102_v11 }
  0x37   :  { %1114 = vmatprep.mubr.msk.f32.mxu0 %vm1278_vm0, %v1279_v6  ;;  %1192 = vmatpush3.bf16.msra.mxu0 %v1191_v51 }
  0x38   :  { %1193 = vmatprep.subr.bf16.mxu0 %v1277_v3 }
  0x3b   :  { %1195 = vmatpush3.bf16.msra.mxu0 %v1194_v53 }
 0x109   :  { %v490_v58 = vpop.f32.mrb[0].mxu0 }
 0x10a   :  { %v1226_v59 = vadd.f32 %v1014_v57, %v490_v58  ;;  %v1105_v60 = vpop.f32.mrb[1].mxu0 }
 0x10c   :  { %v495_v61 = vmul.f32 0.70710677, %v1226_v59  ;;  %v494_v63 = vmul.f32 0.5, %v1226_v59 }
 0x10e   :  { %1251 = verf.f32 %v495_v61 }
 0x118   :  { %v1252_v62 = vpop.eup %1251 }
 0x119   :  { %v497_v0 = vadd.f32 1.0, %v1252_v62 }
 0x11b   :  { %v498_v1 = vmul.f32 %v497_v0, %v494_v63 }
 0x11d   :  { %v512_v2 = vsel %vm510_vm2, %v498_v1, 0 }
 0x11e   :  { %v583_v4 = vand.u32 4294901760, %v512_v2 }
 0x120   :  { %v584_v5 = vsub.f32 %v512_v2, %v583_v4  ;;  %1126 = vmatmul.mubr.f32.vlgmr.msra.gmra.mrb[0].mxu1 %v583_v4 }
 0x121   :  { %1204 = vmatpush3.bf16.msra.mxu1 %v1203_v52  ;;  %1136 = vmatprep.mubr.msk.f32.mxu1 %vm1278_vm0, %v1279_v6 }
 0x122   :  { %1205 = vmatprep.subr.bf16.mxu1 %v1277_v3  ;;  %v585_v7 = vand.u32 4294901760, %v584_v5 }
 0x124   :  { %v586_v8 = vsub.f32 %v584_v5, %v585_v7 }
 0x125   :  { %1207 = vmatpush3.bf16.msra.mxu1 %v1206_v54 }
 0x126   :  { %v587_v9 = vand.u32 4294901760, %v586_v8  ;;  %1208 = vmatprep.subr.bf16.mxu1 %v1277_v3 }
 0x128   :  { %1115 = vmatmul.mubr.f32.vlgmr.msra.gmra.mrb[2].mxu0 %v587_v9  ;;  %1137 = vmatmul.mubr.f32.vlgmr.msra.gmra.mrb[0].mxu1 %v584_v5 }
 0x129   :  { %1210 = vmatpush3.bf16.msra.mxu1 %v1191_v51  ;;  %1147 = vmatprep.mubr.msk.f32.mxu1 %vm1278_vm0, %v1279_v6 }
 0x12a   :  { %1211 = vmatprep.subr.bf16.mxu1 %v1277_v3 }
 0x12d   :  { %1213 = vmatpush3.bf16.msra.mxu1 %v1194_v53 }
 0x12e   :  { %1214 = vmatprep.subr.bf16.mxu1 %v1277_v3 }
 0x130   :  { %1148 = vmatmul.mubr.f32.vlgmr.msra.gmra.mrb[0].mxu1 %v585_v7 }
 0x131   :  { %1216 = vmatpush3.bf16.msra.mxu1 %v1215_v55  ;;  %1158 = vmatprep.mubr.msk.f32.mxu1 %vm1278_vm0, %v1279_v6 }
 0x132   :  { %1217 = vmatprep.subr.bf16.mxu1 %v1277_v3 }
 0x135   :  { %1219 = vmatpush3.bf16.msra.mxu1 %v1218_v56 }
 0x136   :  { %1220 = vmatprep.subr.bf16.mxu1 %v1277_v3 }
 0x138   :  { %1159 = vmatmul.mubr.f32.vlgmr.msra.gmra.mrb[0].mxu1 %v583_v4 }
 0x139   :  { %1222 = vmatpush3.bf16.msra.mxu1 %v1191_v51  ;;  %1169 = vmatprep.mubr.msk.f32.mxu1 %vm1278_vm0, %v1279_v6 }
 0x13a   :  { %1223 = vmatprep.subr.bf16.mxu1 %v1277_v3 }
 0x13d   :  { %1225 = vmatpush3.bf16.msra.mxu1 %v1194_v53 }
 0x140   :  { %1170 = vmatmul.mubr.f32.vlgmr.msra.gmra.mrb[0].mxu1 %v583_v4 }
 0x1fb   :  { %v589_v10 = vpop.f32.mrb[2].mxu0 }
 0x1fc   :  { %v1116_v11 = vpop.f32.mrb[3].mxu0  ;;  %v590_v13 = vadd.f32 %v1015_v12, %v589_v10 }
 0x213   :  { %v995_v14 = vpop.f32.mrb[0].mxu1 }
 0x214   :  { %v1228_v15 = vadd.f32 %v995_v14, %v590_v13  ;;  %v1171_v16 = vpop.f32.mrb[1].mxu1 }
 0x216   :  { %999 = vst.msk [vmem:[#allocation2] sm:$0xff] %vm31_vm1, %v1228_v15 }
 0x217   :  { %1264 = shalt.err (!%p1261_p4)
}
 0x218   :  { %s1265_s4 = scalar_lea.hbm %s1399_s5, 128 }
 0x219   :  { %p1266_p5 = scmp.ne.s32.totalorder %s1399_s5, %s1265_s4  ;;  %p1269_p6 = scmp.lt.u32.totalorder %s1265_s4, %s1399_s5 }
 0x21b   :  { %p1271_p7 = pnand %p1269_p6, %p1266_p5 }
 0x21d   :  { %1274 = shalt.err (!%p1271_p7)
}
 0x21e   :  { %1009 = dma.vmem_to_hbm [thread:$0]  %s1007_s8, 128, %s1399_s5, [#allocation3]  }
 0x21f   :  { %1275 = dma.done.wait [#allocation3], 128  }
 0x220   :  { %1276 = vsyncadd [#allocation3], 4294967168 }
 0x221   :  { %1013 = vsyncpa [#allocation3], 1 }

</bundles_post_ra>
